<compile_context>
chip_gen: v6e
topology: v6e:2x2x1
jax: 0.10.0
libtpu: 0.0.40
codegen_flags: <defaults>
</compile_context>

<pallas_src>
import functools

import jax
import jax.numpy as jnp
from jax import lax
from jax.experimental import pallas as pl
from jax.experimental.pallas import tpu as pltpu


def decoder_kernel(x_ref, w1t_ref, b1_ref, w2_ref, b2_ref, o_ref, *, b_tile, out_dim):
    # x_ref:  (b_tile, Z, L)   w1t_ref: (Z2, Z)   b1_ref: (Z2, 1)
    # w2_ref: (Z2, O)          b2_ref:  (O, 1)    o_ref:  (b_tile, O, L)
    w1t = w1t_ref[...]
    b1 = b1_ref[...]
    w2 = w2_ref[...]
    b2 = b2_ref[...]

    length = x_ref.shape[-1]
    inv_l = jnp.float32(1.0 / length)

    # Small static loop over the samples in this batch tile.
    for b in range(b_tile):
        x = x_ref[b]                                                     # (Z, L)

        # ConvTranspose1d(k=1): h[c, l] = sum_i W1[i, c] * x[i, l] + b1[c]
        h = jnp.dot(w1t, x, preferred_element_type=jnp.float32) + b1     # (Z2, L)

        # InstanceNorm1d over L (lane axis): one-pass biased stats, eps=1e-5.
        mean = jnp.sum(h, axis=-1, keepdims=True) * inv_l                # (Z2, 1)
        mean_sq = jnp.sum(h * h, axis=-1, keepdims=True) * inv_l
        var = jnp.maximum(mean_sq - mean * mean, 0.0)
        h = (h - mean) * lax.rsqrt(var + 1e-5)

        # ReLU
        h = jnp.maximum(h, 0.0)

        # Second ConvTranspose1d(k=1): Z2 -> O
        if out_dim == 1:
            # Tiny matvec: keep it off the MXU — VPU multiply + sublane reduce.
            y = jnp.sum(h * w2, axis=0, keepdims=True) + b2              # (1, L)
        else:
            y = lax.dot_general(
                w2, h,
                dimension_numbers=(((0,), (0,)), ((), ())),
                preferred_element_type=jnp.float32,
            ) + b2                                                       # (O, L)

        o_ref[b] = y.astype(o_ref.dtype)


def _pick_batch_tile(n, z, length, out_dim, budget_bytes=8 << 20):
    """Batch tile that amortizes grid-step overhead while staying well within
    v7x's tighter VMEM budget and keeping >= 2 grid steps for 2-TC sharding."""
    per_sample = (z * length + out_dim * length) * 4 * 2  # f32, double-buffered in+out
    cap = max(1, budget_bytes // max(per_sample, 1))
    for cand in (8, 4, 2):
        if cand <= cap and n % cand == 0 and (n // cand) >= 2:
            return cand
    return 1


def decoder_forward(x_ncl, w1, b1, w2, b2):
    """x_ncl: (N, Z, L) float32 (PyTorch NCL layout). Returns (N, out_dim, L)."""
    N, Z, L = x_ncl.shape
    Z2 = w1.shape[1]
    O = w2.shape[1]

    b_tile = _pick_batch_tile(N, Z, L, O)
    grid = (N // b_tile,)

    # Tiny weight reshapes only (no activation transposes through HBM).
    w1t = jnp.transpose(w1)          # (Z2, Z)
    b1_2d = b1.reshape(Z2, 1)
    b2_2d = b2.reshape(O, 1)

    flops = 2 * N * L * Z * Z2 + 2 * N * L * Z2 * O + 8 * N * L * Z2
    bytes_accessed = 4 * (N * Z * L + N * O * L + Z * Z2 + Z2 + Z2 * O + O)

    kernel = functools.partial(decoder_kernel, b_tile=b_tile, out_dim=O)

    return pl.pallas_call(
        kernel,
        out_shape=jax.ShapeDtypeStruct((N, O, L), jnp.float32),
        grid_spec=pltpu.PrefetchScalarGridSpec(
            num_scalar_prefetch=0,
            grid=grid,
            in_specs=[
                pl.BlockSpec((b_tile, Z, L), lambda n: (n, 0, 0)),
                pl.BlockSpec((Z2, Z), lambda n: (0, 0)),
                pl.BlockSpec((Z2, 1), lambda n: (0, 0)),
                pl.BlockSpec((Z2, O), lambda n: (0, 0)),
                pl.BlockSpec((O, 1), lambda n: (0, 0)),
            ],
            out_specs=pl.BlockSpec((b_tile, O, L), lambda n: (n, 0, 0)),
        ),
        compiler_params=pltpu.CompilerParams(
            dimension_semantics=("parallel",),
        ),
        cost_estimate=pl.CostEstimate(
            flops=int(flops),
            transcendentals=int(N * Z2),
            bytes_accessed=int(bytes_accessed),
        ),
    )(x_ncl, w1t, b1_2d, w2, b2_2d)


def init_params(key, z_dim, out_dim=1):
    """Deterministic synthetic init matching the module's parameter shapes.

    ConvTranspose1d weight shape is (in_channels, out_channels, kernel_size);
    with kernel_size=1 we store it as (in, out).
    """
    z2 = z_dim // 2
    k1, k2, k3, k4 = jax.random.split(key, 4)
    bound1 = 1.0 / jnp.sqrt(z_dim)
    bound2 = 1.0 / jnp.sqrt(z2)
    w1 = jax.random.uniform(k1, (z_dim, z2), jnp.float32, -bound1, bound1)
    b1 = jax.random.uniform(k2, (z2,), jnp.float32, -bound1, bound1)
    w2 = jax.random.uniform(k3, (z2, out_dim), jnp.float32, -bound2, bound2)
    b2 = jax.random.uniform(k4, (out_dim,), jnp.float32, -bound2, bound2)
    return w1, b1, w2, b2


def reference_forward(x_ncl, w1, b1, w2, b2):
    """Pure-JAX reference mirroring the PyTorch module (NCL-native)."""
    h = jnp.einsum("nil,ic->ncl", x_ncl, w1) + b1[None, :, None]
    mean = jnp.mean(h, axis=-1, keepdims=True)
    var = jnp.mean((h - mean) ** 2, axis=-1, keepdims=True)
    h = (h - mean) / jnp.sqrt(var + 1e-5)
    h = jnp.maximum(h, 0.0)
    y = jnp.einsum("ncl,co->nol", h, w2) + b2[None, :, None]
    return y


if __name__ == "__main__":
    N, Z, L, OUT = 2, 32, 16, 1  # small shapes consistent with Decoder(z_dim=32)

    key = jax.random.PRNGKey(0)
    kx, kp = jax.random.split(key)
    x = jax.random.normal(kx, (N, Z, L), dtype=jnp.float32)
    w1, b1, w2, b2 = init_params(kp, Z, OUT)

    out = decoder_forward(x, w1, b1, w2, b2)
    out = jax.block_until_ready(out)

    ref = reference_forward(x, w1, b1, w2, b2)
    assert out.shape == (N, OUT, L), out.shape
    assert jnp.allclose(out, ref, atol=1e-4, rtol=1e-4), "mismatch vs reference"

    print("KERNEL_OK")
</pallas_src>

<mosaic_0001>
module attributes {stable_mosaic.version = 11 : i64} {
  func.func @decoder_kernel(%arg0: i32, %arg1: memref<1x32x16xf32, #tpu.memory_space<vmem>>, %arg2: memref<16x32xf32, #tpu.memory_space<vmem>>, %arg3: memref<16x1xf32, #tpu.memory_space<vmem>>, %arg4: memref<16x1xf32, #tpu.memory_space<vmem>>, %arg5: memref<1x1xf32, #tpu.memory_space<vmem>>, %arg6: memref<1x1x16xf32, #tpu.memory_space<vmem>>) attributes {dimension_semantics = [#tpu.dimension_semantics<parallel>], iteration_bounds = array<i64: 2>, scalar_prefetch = 0 : i64, scratch_operands = 0 : i64, tpu.core_type = #tpu.core_type<tc>, window_params = [{transform_indices = @transform_0, window_bounds = array<i64: 1, 32, 16>}, {pipeline_mode = #tpu.pipeline_mode<synchronous>, transform_indices = @transform_1, window_bounds = array<i64: 16, 32>}, {pipeline_mode = #tpu.pipeline_mode<synchronous>, transform_indices = @transform_2, window_bounds = array<i64: 16, 1>}, {pipeline_mode = #tpu.pipeline_mode<synchronous>, transform_indices = @transform_3, window_bounds = array<i64: 16, 1>}, {pipeline_mode = #tpu.pipeline_mode<synchronous>, transform_indices = @transform_4, window_bounds = array<i64: 1, 1>}, {transform_indices = @transform_5, window_bounds = array<i64: 1, 1, 16>}]} {
    %c0 = arith.constant 0 : index
    %c0_0 = arith.constant 0 : index
    %0 = vector.load %arg2[%c0, %c0_0] : memref<16x32xf32, #tpu.memory_space<vmem>>, vector<16x32xf32>
    %c0_1 = arith.constant 0 : index
    %c0_2 = arith.constant 0 : index
    %1 = vector.load %arg3[%c0_1, %c0_2] : memref<16x1xf32, #tpu.memory_space<vmem>>, vector<16x1xf32>
    %c0_3 = arith.constant 0 : index
    %c0_4 = arith.constant 0 : index
    %2 = vector.load %arg4[%c0_3, %c0_4] : memref<16x1xf32, #tpu.memory_space<vmem>>, vector<16x1xf32>
    %c0_5 = arith.constant 0 : index
    %c0_6 = arith.constant 0 : index
    %3 = vector.load %arg5[%c0_5, %c0_6] : memref<1x1xf32, #tpu.memory_space<vmem>>, vector<1x1xf32>
    %c0_7 = arith.constant 0 : index
    %c0_8 = arith.constant 0 : index
    %c0_9 = arith.constant 0 : index
    %4 = vector.load %arg1[%c0_7, %c0_8, %c0_9] : memref<1x32x16xf32, #tpu.memory_space<vmem>>, vector<1x32x16xf32>
    %5 = vector.shape_cast %4 : vector<1x32x16xf32> to vector<32x16xf32>
    %cst = arith.constant dense<0.000000e+00> : vector<16x16xf32>
    %6 = tpu.matmul %0, %5, %cst {dimension_numbers = #tpu.dot_dimension_numbers<[1], [0], [0], [1], [0, 0, 1, 1], [], []>} : vector<16x32xf32>, vector<32x16xf32>, vector<16x16xf32> -> vector<16x16xf32>
    %7 = vector.broadcast %1 : vector<16x1xf32> to vector<16x16xf32>
    %8 = arith.addf %6, %7 : vector<16x16xf32>
    %cst_10 = arith.constant dense<0.000000e+00> : vector<16xf32>
    %9 = vector.multi_reduction <add>, %8, %cst_10 [1] : vector<16x16xf32> to vector<16xf32>
    %10 = vector.shape_cast %9 : vector<16xf32> to vector<16x1xf32>
    %cst_11 = arith.constant 6.250000e-02 : f32
    %11 = vector.broadcast %cst_11 : f32 to vector<16x1xf32>
    %12 = arith.mulf %10, %11 : vector<16x1xf32>
    %13 = arith.mulf %8, %8 : vector<16x16xf32>
    %cst_12 = arith.constant dense<0.000000e+00> : vector<16xf32>
    %14 = vector.multi_reduction <add>, %13, %cst_12 [1] : vector<16x16xf32> to vector<16xf32>
    %15 = vector.shape_cast %14 : vector<16xf32> to vector<16x1xf32>
    %cst_13 = arith.constant 6.250000e-02 : f32
    %16 = vector.broadcast %cst_13 : f32 to vector<16x1xf32>
    %17 = arith.mulf %15, %16 : vector<16x1xf32>
    %18 = arith.mulf %12, %12 : vector<16x1xf32>
    %19 = arith.subf %17, %18 : vector<16x1xf32>
    %cst_14 = arith.constant 0.000000e+00 : f32
    %20 = vector.broadcast %cst_14 : f32 to vector<16x1xf32>
    %21 = arith.maximumf %19, %20 : vector<16x1xf32>
    %22 = vector.broadcast %12 : vector<16x1xf32> to vector<16x16xf32>
    %23 = arith.subf %8, %22 : vector<16x16xf32>
    %cst_15 = arith.constant 9.99999974E-6 : f32
    %24 = vector.broadcast %cst_15 : f32 to vector<16x1xf32>
    %25 = arith.addf %21, %24 : vector<16x1xf32>
    %26 = math.rsqrt %25 : vector<16x1xf32>
    %27 = vector.broadcast %26 : vector<16x1xf32> to vector<16x16xf32>
    %28 = arith.mulf %23, %27 : vector<16x16xf32>
    %cst_16 = arith.constant 0.000000e+00 : f32
    %29 = vector.broadcast %cst_16 : f32 to vector<16x16xf32>
    %30 = arith.maximumf %28, %29 : vector<16x16xf32>
    %31 = vector.broadcast %2 : vector<16x1xf32> to vector<16x16xf32>
    %32 = arith.mulf %30, %31 : vector<16x16xf32>
    %cst_17 = arith.constant dense<0.000000e+00> : vector<16xf32>
    %33 = vector.multi_reduction <add>, %32, %cst_17 [0] : vector<16x16xf32> to vector<16xf32>
    %34 = vector.shape_cast %33 : vector<16xf32> to vector<1x16xf32>
    %35 = vector.broadcast %3 : vector<1x1xf32> to vector<1x16xf32>
    %36 = arith.addf %34, %35 : vector<1x16xf32>
    %c0_18 = arith.constant 0 : index
    %c0_19 = arith.constant 0 : index
    %c0_20 = arith.constant 0 : index
    %37 = vector.load %arg6[%c0_18, %c0_19, %c0_20] : memref<1x1x16xf32, #tpu.memory_space<vmem>>, vector<1x1x16xf32>
    %38 = vector.shape_cast %37 : vector<1x1x16xf32> to vector<1x16xf32>
    %39 = vector.shape_cast %36 : vector<1x16xf32> to vector<1x1x16xf32>
    tpu.vector_store %arg6[%c0_18, %c0_19, %c0_20], %39 {strides = array<i32>} : memref<1x1x16xf32, #tpu.memory_space<vmem>>, vector<1x1x16xf32>,
    return
  }
  func.func @transform_0(%arg0: i32) -> (i32, i32, i32) {
    %c0_i32 = arith.constant 0 : i32
    %c0_i32_0 = arith.constant 0 : i32
    %c0_i32_1 = arith.constant 0 : i32
    return %arg0, %c0_i32, %c0_i32_0 : i32, i32, i32
  }
  func.func @transform_1(%arg0: i32) -> (i32, i32) {
    %c0_i32 = arith.constant 0 : i32
    %c0_i32_0 = arith.constant 0 : i32
    %c0_i32_1 = arith.constant 0 : i32
    return %c0_i32, %c0_i32_0 : i32, i32
  }
  func.func @transform_2(%arg0: i32) -> (i32, i32) {
    %c0_i32 = arith.constant 0 : i32
    %c0_i32_0 = arith.constant 0 : i32
    %c0_i32_1 = arith.constant 0 : i32
    return %c0_i32, %c0_i32_0 : i32, i32
  }
  func.func @transform_3(%arg0: i32) -> (i32, i32) {
    %c0_i32 = arith.constant 0 : i32
    %c0_i32_0 = arith.constant 0 : i32
    %c0_i32_1 = arith.constant 0 : i32
    return %c0_i32, %c0_i32_0 : i32, i32
  }
  func.func @transform_4(%arg0: i32) -> (i32, i32) {
    %c0_i32 = arith.constant 0 : i32
    %c0_i32_0 = arith.constant 0 : i32
    %c0_i32_1 = arith.constant 0 : i32
    return %c0_i32, %c0_i32_0 : i32, i32
  }
  func.func @transform_5(%arg0: i32) -> (i32, i32, i32) {
    %c0_i32 = arith.constant 0 : i32
    %c0_i32_0 = arith.constant 0 : i32
    %c0_i32_1 = arith.constant 0 : i32
    return %arg0, %c0_i32, %c0_i32_0 : i32, i32, i32
  }
}

</mosaic_0001>

<bundles_post_ra>
// kernel: tpu_custom_call.1
= control target key start
LH: loop header
LB: loop body
LE: loop exit
PB: predicated region body
PF: predicated region fallthrough
CT: control target
= control target key end

     0   :  { %s748_s0 = inlined_call_operand.vmem [shape: f32[2,32,16], index: 0, kind: input, shape index: {}]   ;;  %s749_s1 = inlined_call_operand.vmem [shape: f32[16,32], index: 1, kind: input, shape index: {}]   ;;  %s750_s2 = inlined_call_operand.vmem [shape: f32[16,1], index: 2, kind: input, shape index: {}]   ;;  %s751_s3 = inlined_call_operand.vmem [shape: f32[16,1], index: 3, kind: input, shape index: {}]   ;;  %s752_s4 = inlined_call_operand.<no memory space> [shape: f32[1,1], index: 4, kind: input, shape index: {}]   ;;  %s753_s5 = inlined_call_operand.hbm [shape: f32[2,1,16], index: 5, kind: output, shape index: {}]  }
   0x1   :  { %v10_v0 = vstv %s752_s4 }
   0x2   :  { %11 = vst [vmem:[#allocation2] sm:$0x1] %v10_v0 }
   0x3   :  { %12 = vsyncpa [#allocation4], 0 }
   0x4   :  { %14 = vsyncpa [#allocation4 + $0x1], 0  ;;  %s635_s20 = smov 0   ;;  %s637_s21 = smov 0  }
   0x5   :  { %s639_s22 = smov 0   ;;  %s641_s23 = smov 0  }
   0x6 LB: > { %s656_s4 = sadd.s32 4294967295, %s598_s23   ;;  %s463_s24 = sadd.s32 4294967294, %s598_s23   ;;  %s598_s23 = sphi %s641_s23, %s759_s23   ;;  %s594_s22 = sphi %s639_s22, %s758_s22   ;;  %s590_s21 = sphi %s637_s21, %s757_s21   ;;  %s586_s20 = sphi %s635_s20, %s756_s20  }
   0x7   : > { %s660_s25 = sadd.s32 1, %s598_s23   ;;  %s137_s26 = sadd.s32 1, %s594_s22 }
   0x8   : > { %s134_s27 = ssub.s32 %s598_s23, %s660_s25  ;;  %p147_p0 = scmp.ne.s32.totalorder %s594_s22, %s590_s21 }
   0x9   : > { %p135_p1 = scmp.eq.s32.totalorder %s134_s27, 0  ;;  %p148_p2 = scmp.eq.s32.totalorder %s656_s4, 1 }
   0xa   : > { %p153_p3 = scmp.ne.s32.totalorder %s590_s21, %s586_s20  ;;  %p154_p4 = scmp.eq.s32.totalorder %s463_s24, 1 }
   0xb   : > { %s671_s28 = scalar_select %p135_p1, %s594_s22, %s137_s26  }
   0xc   : > { %p673_p5 = por %p148_p2, %p147_p0  ;;  %p677_p6 = por %p154_p4, %p153_p3 }
   0xd   : > { %p466_p7 = scmp.ge.s32.totalorder %s598_s23, 1  ;;  %p192_p8 = scmp.lt.s32.totalorder %s598_s23, 3 }
   0xf   : > { %p193_p9 = pnand %p466_p7, %p192_p8 }
  0x10   : > { %p219_p10 = scmp.lt.s32.totalorder (!%p193_p9), %s656_s4, 1  ;;  %s217_s6 = sand.u32 (!%p193_p9), 1, %s590_s21  }
  0x11   : > { %196 = sbr.rel (%p193_p9) target bundleno = 435 (0x1b3), region = 40  ;;  %s471_s7 = sshll.u32 (!%p193_p9), %s656_s4, 4 }
  0x12   : > { %s218_s8 = scalar_lea.vmem (!%p193_p9), [#allocation3], %s217_s6  ;;  %s406_s12 = scalar_lea.hbm (!%p193_p9), %s753_s5, %s471_s7 }
  0x13   : > { %s408_s9 = sshll.u32 (!%p193_p9), %s218_s8, 4  ;;  %s601_s15 = smov (!%p193_p9), [#allocation3]   ;;  %s409_s9 = int_to_ptr.vmem [resolvable:$true] %s408_s9 }
  0x14   : > { %s538_s14 = scalar_lea.vmem (!%p193_p9), %s409_s9, 16 }
  0x15   : > { %p539_p11 = scmp.ne.s32.totalorder (!%p193_p9), %s409_s9, %s538_s14 }
  0x16   : > { %v224_v1 = vld [vmem:[%s749_s1] sm:$0xff]  ;;  %vm245_vm0 = vcmask 261120   ;;  %v600_v3 = vmov 0   ;;  %s220_s10 = scalar_select %p219_p10, %s656_s4, 1  ;;  %v227_v4 = vld [vmem:[%s750_s2 + $0x8] sm:$0xff]  ;;  %vm327_vm1 = vcmask 130048   ;;  %v388_v56 = vlaneseq }
  0x17   : > { %v226_v2 = vld [vmem:[%s750_s2] sm:$0xff]  ;;  %489 = vmatprep.mubr.msk.f32.mxu0 %vm245_vm0, %v224_v1  ;;  %532 = vset.pattern.permute.xlu0 %v600_v3  ;;  %v225_v9 = vld [vmem:[%s749_s1 + $0x8] sm:$0xff]  ;;  %vm393_vm2 = vcmask 122880   ;;  %p540_p12 = pnand %p539_p11, %p673_p5  ;;  %s542_s4 = sshll.u32 %s601_s15, 4  ;;  %s543_s4 = int_to_ptr.vmem [resolvable:$false] %s542_s4 }
  0x18   : > { %237 = vperm.xlu0 %532, %v226_v2   ;;  %533 = vset.pattern.permute.xlu1 %v600_v3  ;;  %s474_s13 = sshll.u32 %s220_s10, 5  ;;  %v228_v22 = vld [vmem:[%s751_s3] sm:$0xff]  ;;  %v229_v23 = vld [vmem:[%s751_s3 + $0x8] sm:$0xff]  ;;  %v389_v59 = vshrl.u32 %v388_v56, 7  ;;  %p545_p0 = scmp.lt.s32.totalorder %s409_s9, %s543_s4 }
  0x19   : > { %s223_s16 = scalar_lea.vmem %s748_s0, %s474_s13  ;;  %v230_v24 = vld [vmem:[#allocation2] sm:$0x1]  ;;  %s396_s13 = scalar_lea.sflag [#allocation4], %s217_s6 }
  0x1a   : > { %v234_v5 = vld [vmem:[%s223_s16 + $0x18] sm:$0xff]  ;;  %v233_v6 = vld [vmem:[%s223_s16 + $0x10] sm:$0xff]  ;;  %v232_v7 = vld [vmem:[%s223_s16 + $0x8] sm:$0xff]  ;;  %v390_v62 = vsub.s32 0, %v389_v59  ;;  %p541_p13 = pneg %p540_p12 }
  0x1b   : > { %481 = vmatprep.subr.mxu0 %v234_v5  ;;  %v231_v8 = vld [vmem:[%s223_s16] sm:$0xff]  ;;  %s544_s16 = scalar_lea.vmem %s543_s4, 32 }
  0x1c   : > { %242 = vperm.xlu0 %532, %v227_v4   ;;  %482 = vmatpush3.msra.mxu0 %v234_v5  ;;  %p546_p1 = scmp.lt.s32.totalorder %s544_s16, %s538_s14 }
  0x1d   : > { %483 = vmatprep.subr.mxu0 %v233_v6 }
  0x1e   : > { %484 = vmatpush3.msra.mxu0 %v233_v6  ;;  %p547_p2 = por %p546_p1, %p545_p0 }
  0x1f   : > { %485 = vmatprep.subr.mxu0 %v232_v7 }
  0x20   : > { %486 = vmatpush3.msra.mxu0 %v232_v7  ;;  %p548_p3 = pnand %p547_p2, %p541_p13 }
  0x21   : > { %487 = vmatprep.subr.mxu0 %v231_v8 }
  0x22   : > { %488 = vmatpush3.msra.mxu0 %v231_v8 }
  0x23   : > { %490 = vmatmul.mubr.msk.f32.vlgmr.msra.gmra.mxu0 %vm245_vm0, %v225_v9 }
  0x93   : > { %v238_v10 = vpop.permute.xlu0 %237 }
  0x97   : > { %v243_v11 = vpop.permute.xlu0 %242 }
  0xe3   : > { %v491_v12 = vpop.f32.mrf.mxu0 }
  0xe4   : > { %v324_v13 = vadd.f32 %v491_v12, %v243_v11 }
  0xe5   : > { %v318_v14 = vpop.f32.mrf.mxu0 }
  0xe6   : > { %v319_v15 = vadd.f32 %v318_v14, %v238_v10  ;;  %v331_v16 = vsel %vm327_vm1, %v324_v13, 0.0  ;;  %v337_v20 = vmul.f32 %v324_v13, %v324_v13 }
  0xe7   : > { %332 = vadd.xlane.f32.xlu1 %v331_v16 }
  0xe8   : > { %v336_v17 = vmul.f32 %v319_v15, %v319_v15  ;;  %v328_v19 = vsel %vm327_vm1, %v319_v15, 0.0  ;;  %v341_v21 = vsel %vm327_vm1, %v337_v20, 0.0 }
  0xea   : > { %v338_v18 = vsel %vm327_vm1, %v336_v17, 0.0 }
  0xeb   : > { %339 = vadd.xlane.f32.xlu0 %v338_v18  ;;  %329 = vadd.xlane.f32.xlu1 %v328_v19 }
  0xef   : > { %342 = vadd.xlane.f32.xlu1 %v341_v21 }
 0x100   : > { %364 = vperm.xlu1 %533, %v228_v22  }
 0x104   : > { %369 = vperm.xlu1 %533, %v229_v23  }
 0x108   : > { %385 = vperm.xlu1 %533, %v230_v24  }
 0x170   : > { %v333_v25 = vpop.xlane.xlu1 %332 }
 0x171   : > { %v335_v28 = vmul.f32 0.0625, %v333_v25 }
 0x173   : > { %v347_v33 = vmul.f32 %v335_v28, %v335_v28  ;;  %v353_v44 = vsub.f32 %v324_v13, %v335_v28 }
 0x174   : > { %v340_v26 = vpop.xlane.xlu0 %339  ;;  %v330_v27 = vpop.xlane.xlu1 %329 }
 0x175   : > { %v334_v29 = vmul.f32 0.0625, %v330_v27  ;;  %v344_v30 = vmul.f32 0.0625, %v340_v26 }
 0x177   : > { %v346_v31 = vmul.f32 %v334_v29, %v334_v29  ;;  %v352_v41 = vsub.f32 %v319_v15, %v334_v29 }
 0x178   : > { %v343_v32 = vpop.xlane.xlu1 %342 }
 0x179   : > { %v348_v34 = vsub.f32 %v344_v30, %v346_v31  ;;  %v345_v35 = vmul.f32 0.0625, %v343_v32 }
 0x17b   : > { %v350_v36 = vmax.f32 %v348_v34, 0.0  ;;  %v349_v37 = vsub.f32 %v345_v35, %v347_v33 }
 0x17c   : > { %v365_v43 = vpop.permute.xlu1 %364 }
 0x17d   : > { %v354_v38 = vadd.f32 1e-05, %v350_v36  ;;  %v351_v39 = vmax.f32 %v349_v37, 0.0 }
 0x17f   : > { %534 = vrsqrt.f32 %v354_v38  ;;  %v355_v40 = vadd.f32 1e-05, %v351_v39 }
 0x180   : > { %v370_v51 = vpop.permute.xlu1 %369 }
 0x181   : > { %536 = vrsqrt.f32 %v355_v40 }
 0x184   : > { %v386_v63 = vpop.permute.xlu1 %385 }
 0x185   : > { %v391_v2 = vrot.slane %v386_v63, %v390_v62 }
 0x18c   : > { %v535_v42 = vpop.eup %534 }
 0x18d   : > { %v358_v45 = vmul.f32 %v535_v42, %v352_v41 }
 0x18e   : > { %v537_v46 = vpop.eup %536 }
 0x18f   : > { %v360_v47 = vmax.f32 %v358_v45, 0.0  ;;  %v359_v48 = vmul.f32 %v537_v46, %v353_v44 }
 0x191   : > { %v372_v49 = vmul.f32 %v365_v43, %v360_v47  ;;  %v361_v50 = vmax.f32 %v359_v48, 0.0 }
 0x193   : > { %v373_v52 = vmul.f32 %v370_v51, %v361_v50  ;;  %v374_v53 = vsel %vm327_vm1, %v372_v49, 0.0 }
 0x195   : > { %v375_v54 = vsel %vm327_vm1, %v373_v52, 0.0 }
 0x196   : > { %v376_v55 = vadd.f32 %v375_v54, %v374_v53 }
 0x198   : > { %v377_v57 = vrot.slane %v376_v55, 4 }
 0x19a   : > { %v378_v58 = vadd.f32 %v377_v57, %v376_v55 }
 0x19c   : > { %v379_v60 = vrot.slane %v378_v58, 2 }
 0x19e   : > { %v380_v61 = vadd.f32 %v379_v60, %v378_v58 }
 0x1a0   : > { %v381_v0 = vrot.slane %v380_v61, 1 }
 0x1a2   : > { %v382_v1 = vadd.f32 %v381_v0, %v380_v61 }
 0x1a4   : > { %v392_v3 = vadd.f32 %v391_v2, %v382_v1 }
 0x1a6   : > { %394 = vst.msk [vmem:[%s218_s8] sm:$0x1] %vm393_vm2, %v392_v3 }
 0x1a7   : > { %551 = shalt.err (!%p548_p3)
}
 0x1a8   : > { %s552_s17 = scalar_lea.hbm %s406_s12, 16  ;;  %s556_s24 = scalar_lea.hbm %s753_s5, 32 }
 0x1a9   : > { %p553_p4 = scmp.ne.s32.totalorder %s406_s12, %s552_s17  ;;  %p557_p9 = scmp.lt.s32.totalorder %s406_s12, %s753_s5 }
 0x1aa   : > { %p558_p10 = scmp.lt.s32.totalorder %s556_s24, %s552_s17 }
 0x1ab   : > { %p554_p7 = pnand %p553_p4, %p673_p5 }
 0x1ac   : > { %p559_p11 = por %p558_p10, %p557_p9 }
 0x1ad   : > { %p555_p8 = pneg %p554_p7 }
 0x1af   : > { %p560_p12 = pnand %p559_p11, %p555_p8 }
 0x1b1   : > { %563 = shalt.err (!%p560_p12)
}
 0x1b2   : > { %492 = dma.vmem_to_hbm [thread:$0]  (%p673_p5), %s409_s9, 16, %s406_s12, %s396_s13  }
 0x1b3 PF: > { %p498_p13 = scmp.ge.s32.totalorder %s598_s23, 2  ;;  %s420_s6 = sand.u32 1, %s586_s20  }
 0x1b4   : > { %s421_s7 = scalar_lea.sflag [#allocation4], %s420_s6 }
 0x1b5   : > { %p495_p0 = pnand %p498_p13, %p677_p6 }
 0x1b7   : > { %p496_p1 = pneg %p495_p0 }
 0x1b9   : > { %581 = dma.done.wait (%p496_p1), %s421_s7, 16  }
 0x1ba   : > { %583 = vsyncadd (%p496_p1), %s421_s7, 4294967280  ;;  %p17_p2 = scmp.ge.s32.totalorder %s660_s25, 4   ;;  %s756_s20 = smov %s590_s21 }
 0x1bb   : > { %s757_s21 = smov %s594_s22  ;;  %s758_s22 = smov %s671_s28 }
 0x1bc   : > { %s759_s23 = smov %s660_s25  ;;  %19 = sbr.rel (!%p17_p2) target bundleno = 6 (0x6), region = 75 }
 0x1c1   :  { %425 = vsyncpa [#allocation4], 1 }
 0x1c2   :  { %427 = vsyncpa [#allocation4 + $0x1], 1 }

</bundles_post_ra>
